<compile_context>
chip_gen: v6e
topology: v6e:2x2x1
jax: 0.10.0
libtpu: 0.0.40
codegen_flags: <defaults>
</compile_context>

<pallas_src>
import functools
import math

import jax
import jax.numpy as jnp
from jax.experimental import pallas as pl
from jax.experimental.pallas import tpu as pltpu


def _feature_attention_kernel(x_ref, wqkv_ref, wp_ref, bp_ref, mask_ref, alibi_ref,
                              o_ref, *, batch_block, token_cnt, head_out, mxu_dtype):
    d_out = wp_ref.shape[0]
    scale = 1.0 / math.sqrt(head_out)

    # (Bb*T, d_in) row slab for `batch_block` batch elements (already cast to mxu_dtype).
    x = x_ref[...]

    # Fused QKV projection: one MXU matmul for the whole slab, f32 accumulation.
    qkv = jnp.dot(x, wqkv_ref[...], preferred_element_type=jnp.float32)   # (rows, 3*d_out) f32

    # Static lane slices of the fused result; fold 1/sqrt(head_out) into q (cheapest place).
    q = qkv[:, :d_out] * scale
    k = qkv[:, d_out:2 * d_out]
    v = qkv[:, 2 * d_out:]

    # Split the sublane axis back into (batch, token) for the token contraction.
    q = q.reshape(batch_block, token_cnt, d_out)
    k = k.reshape(batch_block, token_cnt, d_out)
    v = v.reshape(batch_block, token_cnt, d_out)

    # feature_alibi: additive per-token bias on the values (broadcast over batch & features).
    v = v + alibi_ref[...][None, :, :]                          # (Bb,T,d_out) + (1,T,1)

    # Feature scores per batch element: s[b,i,j] = sum_t q[b,t,i] * k[b,t,j] -> (Bb,d_out,d_out).
    s = jax.lax.dot_general(q.astype(mxu_dtype), k.astype(mxu_dtype),
                            (((1,), (1,)), ((0,), (0,))),
                            preferred_element_type=jnp.float32)

    # Precomputed additive block-diagonal head mask, then f32 softmax over the feature axis.
    # Each row has finite same-head entries, so exp(-1e30 - max) underflows cleanly to 0 and the
    # result is exactly the per-head softmax.
    s = s + mask_ref[...][None, :, :]
    s = s - jnp.max(s, axis=-1, keepdims=True)
    e = jnp.exp(s)
    a = e * pl.reciprocal(jnp.sum(e, axis=-1, keepdims=True), approx=True)

    # context[b,t,i] = sum_j a[b,i,j] * v'[b,t,j] -> (Bb, T, d_out), one batched MXU matmul.
    ctx = jax.lax.dot_general(v.astype(mxu_dtype), a.astype(mxu_dtype),
                              (((2,), (2,)), ((0,), (0,))),
                              preferred_element_type=jnp.float32)
    ctx = ctx.reshape(batch_block * token_cnt, d_out)

    # Output projection (with f32 bias), stored as one dense (rows, d_out) slab.
    out = jnp.dot(ctx.astype(mxu_dtype), wp_ref[...],
                  preferred_element_type=jnp.float32) + bp_ref[...]
    o_ref[...] = out.astype(o_ref.dtype)


def _vmem_bytes_estimate(bb, token_cnt, d_in, d_out, mxu_bytes):
    """Rough per-grid-step VMEM working-set estimate (bytes)."""
    rows = bb * token_cnt
    # Streamed operands are double-buffered by the BlockSpec pipeline.
    streamed = 2 * rows * d_in * mxu_bytes + 2 * rows * d_out * 4
    # Constant-index operands still get double-buffered VMEM allocations.
    resident = 2 * (d_in * 3 * d_out * mxu_bytes + d_out * d_out * mxu_bytes   # Wqkv, Wp
                    + d_out * d_out * 4 + d_out * 4 + token_cnt * 4)           # mask, bias, alibi
    # Live f32 intermediates: qkv/q/k/v/ctx/out temporaries (~10 (rows, d_out) slabs) plus
    # ~3 live copies of the (bb, d_out, d_out) score/softmax tensors.
    interm = 10 * rows * d_out * 4 + 3 * bb * d_out * d_out * 4
    return streamed + resident + interm


def feature_attention(x, wq, wk, wv, wp, bp, feature_alibi, head_cnt,
                      batch_block=None, mxu_dtype=jnp.bfloat16):
    """x: (B, T, d_in); weights stored pre-transposed as (in, out) so y = x @ W (+ b)."""
    B, T, d_in = x.shape
    d_out = wq.shape[1]
    assert d_out % head_cnt == 0, "d_out must be divisible by head_cnt"
    head_out = d_out // head_cnt
    # Sublane constraint: (Bb*T, d) blocks and the relayout-free (Bb*T,d) <-> (Bb,T,d) reshapes
    # need the token count to be a multiple of 8.
    assert T % 8 == 0, "token_cnt must be a multiple of 8"
    out_dtype = x.dtype
    mxu_bytes = jnp.dtype(mxu_dtype).itemsize

    if batch_block is None:
        # Largest divisor of B whose working set fits the VMEM budget; capped at B//2 so the
        # 1-D "parallel" grid has >= 2 steps and both v7x TensorCores get work.
        budget = 40 << 20
        bb_cap = B if B < 2 else B // 2
        batch_block = 1
        for cand in range(bb_cap, 0, -1):
            if B % cand == 0 and _vmem_bytes_estimate(cand, T, d_in, d_out, mxu_bytes) <= budget:
                batch_block = cand
                break
    assert B % batch_block == 0
    rows = batch_block * T

    est = _vmem_bytes_estimate(batch_block, T, d_in, d_out, mxu_bytes)
    vmem_limit = int(min(max(2 * est, 32 << 20), 48 << 20))

    # Operand preparation (plain XLA, outside the kernel).
    x_flat = x.reshape(B * T, d_in).astype(mxu_dtype)
    wqkv = jnp.concatenate([wq, wk, wv], axis=1).astype(mxu_dtype)     # (d_in, 3*d_out)
    wp_m = wp.astype(mxu_dtype)
    bp2d = bp.reshape(1, d_out).astype(jnp.float32)
    alibi = feature_alibi[-T:].reshape(T, 1).astype(jnp.float32)
    head_ids = jnp.arange(d_out, dtype=jnp.int32) // head_out
    mask = jnp.where(head_ids[:, None] == head_ids[None, :], 0.0, -1e30).astype(jnp.float32)

    kernel = functools.partial(
        _feature_attention_kernel, batch_block=batch_block, token_cnt=T,
        head_out=head_out, mxu_dtype=mxu_dtype)

    out_flat = pl.pallas_call(
        kernel,
        out_shape=jax.ShapeDtypeStruct((B * T, d_out), out_dtype),
        grid_spec=pltpu.PrefetchScalarGridSpec(
            num_scalar_prefetch=0,
            grid=(B // batch_block,),
            in_specs=[
                pl.BlockSpec((rows, d_in), lambda b: (b, 0)),        # x row slab (streamed)
                pl.BlockSpec((d_in, 3 * d_out), lambda b: (0, 0)),   # fused W_{q,k,v} (resident)
                pl.BlockSpec((d_out, d_out), lambda b: (0, 0)),      # proj weight     (resident)
                pl.BlockSpec((1, d_out), lambda b: (0, 0)),          # proj bias       (resident)
                pl.BlockSpec((d_out, d_out), lambda b: (0, 0)),      # head mask       (resident)
                pl.BlockSpec((T, 1), lambda b: (0, 0)),              # feature_alibi   (resident)
            ],
            out_specs=pl.BlockSpec((rows, d_out), lambda b: (b, 0)),
        ),
        compiler_params=pltpu.CompilerParams(
            dimension_semantics=("parallel",),
            vmem_limit_bytes=vmem_limit),
    )(x_flat, wqkv, wp_m, bp2d, mask, alibi)

    return out_flat.reshape(B, T, d_out)


def feature_attention_reference(x, wq, wk, wv, wp, bp, feature_alibi, head_cnt):
    B, T, d_in = x.shape
    d_out = wq.shape[1]
    ho = d_out // head_cnt
    q = x @ wq
    k = x @ wk
    v = x @ wv
    qh = q.reshape(B, T, head_cnt, ho).transpose(0, 2, 1, 3)       # (B,H,T,ho)
    kh = k.reshape(B, T, head_cnt, ho).transpose(0, 2, 1, 3)
    vh = v.reshape(B, T, head_cnt, ho).transpose(0, 2, 1, 3)
    s = jnp.einsum('bhti,bhtj->bhij', qh, kh) / math.sqrt(ho)      # (B,H,ho,ho)
    a = jax.nn.softmax(s, axis=-1)
    vh = vh + feature_alibi[-T:].reshape(1, 1, T, 1)
    ctx = jnp.einsum('bhij,bhtj->bhti', a, vh)                     # (B,H,T,ho)
    ctx = ctx.transpose(0, 2, 1, 3).reshape(B, T, d_out)
    return ctx @ wp + bp


if __name__ == "__main__":
    # Small shapes consistent with the module.
    context_length = 8          # block_size; token_cnt == context_length here
    T = context_length
    d_in = 32
    d_out = 32
    head_cnt = 4                # head_out = 8

    key = jax.random.PRNGKey(0)
    kx, kq, kk, kv, kp, kb, kx2 = jax.random.split(key, 7)

    # Deterministic parameter init (nn.Linear-style uniform +-1/sqrt(fan_in)),
    # stored as (in_features, out_features). qkv_bias=False; proj has bias.
    lim_in = 1.0 / math.sqrt(d_in)
    lim_out = 1.0 / math.sqrt(d_out)
    wq = jax.random.uniform(kq, (d_in, d_out), jnp.float32, -lim_in, lim_in)
    wk = jax.random.uniform(kk, (d_in, d_out), jnp.float32, -lim_in, lim_in)
    wv = jax.random.uniform(kv, (d_in, d_out), jnp.float32, -lim_in, lim_in)
    wp = jax.random.uniform(kp, (d_out, d_out), jnp.float32, -lim_out, lim_out)
    bp = jax.random.uniform(kb, (d_out,), jnp.float32, -lim_out, lim_out)

    # feature_alibi = [1/i for i in range(context_length, 0, -1)]
    feature_alibi = 1.0 / jnp.arange(context_length, 0, -1, dtype=jnp.float32)

    # Tolerance reflects bf16 MXU operands (with f32 accumulation) vs the pure-f32 reference,
    # plus the EUP approximate reciprocal in the softmax denominator.
    tol = dict(atol=5e-2, rtol=5e-2)

    # Case 1: B=2 -> batch_block=1, grid=(2,) (both v7x TensorCores get a step).
    x = jax.random.normal(kx, (2, T, d_in), dtype=jnp.float32)
    out = jax.block_until_ready(
        feature_attention(x, wq, wk, wv, wp, bp, feature_alibi, head_cnt))
    ref = feature_attention_reference(x, wq, wk, wv, wp, bp, feature_alibi, head_cnt)
    assert out.shape == (2, T, d_out)
    assert jnp.allclose(out, ref, **tol), "mismatch vs JAX reference (B=2)"

    # Case 2: B=8 -> batch_block=4, grid=(2,); exercises the multi-batch-element slab path.
    x2 = jax.random.normal(kx2, (8, T, d_in), dtype=jnp.float32)
    out2 = jax.block_until_ready(
        feature_attention(x2, wq, wk, wv, wp, bp, feature_alibi, head_cnt))
    ref2 = feature_attention_reference(x2, wq, wk, wv, wp, bp, feature_alibi, head_cnt)
    assert out2.shape == (8, T, d_out)
    assert jnp.allclose(out2, ref2, **tol), "mismatch vs JAX reference (B=8)"

    print("KERNEL_OK")
</pallas_src>

<mosaic_0001>
module attributes {stable_mosaic.version = 11 : i64} {
  func.func @_feature_attention_kernel(%arg0: i32, %arg1: memref<8x32xbf16, #tpu.memory_space<vmem>>, %arg2: memref<32x96xbf16, #tpu.memory_space<vmem>>, %arg3: memref<32x32xbf16, #tpu.memory_space<vmem>>, %arg4: memref<1x32xf32, #tpu.memory_space<vmem>>, %arg5: memref<32x32xf32, #tpu.memory_space<vmem>>, %arg6: memref<8x1xf32, #tpu.memory_space<vmem>>, %arg7: memref<8x32xf32, #tpu.memory_space<vmem>>) attributes {dimension_semantics = [#tpu.dimension_semantics<parallel>], iteration_bounds = array<i64: 2>, scalar_prefetch = 0 : i64, scratch_operands = 0 : i64, tpu.core_type = #tpu.core_type<tc>, window_params = [{transform_indices = @transform_0, window_bounds = array<i64: 8, 32>}, {pipeline_mode = #tpu.pipeline_mode<synchronous>, transform_indices = @transform_1, window_bounds = array<i64: 32, 96>}, {pipeline_mode = #tpu.pipeline_mode<synchronous>, transform_indices = @transform_2, window_bounds = array<i64: 32, 32>}, {pipeline_mode = #tpu.pipeline_mode<synchronous>, transform_indices = @transform_3, window_bounds = array<i64: 1, 32>}, {pipeline_mode = #tpu.pipeline_mode<synchronous>, transform_indices = @transform_4, window_bounds = array<i64: 32, 32>}, {pipeline_mode = #tpu.pipeline_mode<synchronous>, transform_indices = @transform_5, window_bounds = array<i64: 8, 1>}, {transform_indices = @transform_6, window_bounds = array<i64: 8, 32>}]} {
    %c0 = arith.constant 0 : index
    %c0_0 = arith.constant 0 : index
    %0 = vector.load %arg1[%c0, %c0_0] : memref<8x32xbf16, #tpu.memory_space<vmem>>, vector<8x32xbf16>
    %c0_1 = arith.constant 0 : index
    %c0_2 = arith.constant 0 : index
    %1 = vector.load %arg2[%c0_1, %c0_2] : memref<32x96xbf16, #tpu.memory_space<vmem>>, vector<32x96xbf16>
    %cst = arith.constant dense<0.000000e+00> : vector<8x96xf32>
    %2 = tpu.matmul %0, %1, %cst {dimension_numbers = #tpu.dot_dimension_numbers<[1], [0], [0], [1], [0, 0, 1, 1], [], []>} : vector<8x32xbf16>, vector<32x96xbf16>, vector<8x96xf32> -> vector<8x96xf32>
    %3 = vector.extract_strided_slice %2 {offsets = [0, 0], sizes = [8, 32], strides = [1, 1]} : vector<8x96xf32> to vector<8x32xf32>
    %cst_3 = arith.constant 0.353553385 : f32
    %4 = vector.broadcast %cst_3 : f32 to vector<8x32xf32>
    %5 = arith.mulf %3, %4 : vector<8x32xf32>
    %6 = vector.extract_strided_slice %2 {offsets = [0, 32], sizes = [8, 32], strides = [1, 1]} : vector<8x96xf32> to vector<8x32xf32>
    %7 = vector.extract_strided_slice %2 {offsets = [0, 64], sizes = [8, 32], strides = [1, 1]} : vector<8x96xf32> to vector<8x32xf32>
    %8 = vector.shape_cast %5 : vector<8x32xf32> to vector<1x8x32xf32>
    %9 = vector.shape_cast %6 : vector<8x32xf32> to vector<1x8x32xf32>
    %10 = vector.shape_cast %7 : vector<8x32xf32> to vector<1x8x32xf32>
    %c0_4 = arith.constant 0 : index
    %c0_5 = arith.constant 0 : index
    %11 = vector.load %arg6[%c0_4, %c0_5] : memref<8x1xf32, #tpu.memory_space<vmem>>, vector<8x1xf32>
    %12 = vector.shape_cast %11 : vector<8x1xf32> to vector<1x8x1xf32>
    %13 = vector.broadcast %12 : vector<1x8x1xf32> to vector<1x8x32xf32>
    %14 = arith.addf %10, %13 : vector<1x8x32xf32>
    %15 = arith.truncf %8 : vector<1x8x32xf32> to vector<1x8x32xbf16>
    %16 = arith.truncf %9 : vector<1x8x32xf32> to vector<1x8x32xbf16>
    %cst_6 = arith.constant dense<0.000000e+00> : vector<1x32x32xf32>
    %17 = tpu.matmul %15, %16, %cst_6 {dimension_numbers = #tpu.dot_dimension_numbers<[1], [1], [2], [2], [0, 0, 0, 2, 1, 2], [0], [0]>} : vector<1x8x32xbf16>, vector<1x8x32xbf16>, vector<1x32x32xf32> -> vector<1x32x32xf32>
    %c0_7 = arith.constant 0 : index
    %c0_8 = arith.constant 0 : index
    %18 = vector.load %arg5[%c0_7, %c0_8] : memref<32x32xf32, #tpu.memory_space<vmem>>, vector<32x32xf32>
    %19 = vector.shape_cast %18 : vector<32x32xf32> to vector<1x32x32xf32>
    %20 = arith.addf %17, %19 : vector<1x32x32xf32>
    %cst_9 = arith.constant dense<0xFF800000> : vector<1x32xf32>
    %21 = vector.multi_reduction <maximumf>, %20, %cst_9 [2] : vector<1x32x32xf32> to vector<1x32xf32>
    %22 = vector.shape_cast %21 : vector<1x32xf32> to vector<1x32x1xf32>
    %23 = vector.broadcast %22 : vector<1x32x1xf32> to vector<1x32x32xf32>
    %24 = arith.subf %20, %23 : vector<1x32x32xf32>
    %25 = math.exp %24 : vector<1x32x32xf32>
    %cst_10 = arith.constant dense<0.000000e+00> : vector<1x32xf32>
    %26 = vector.multi_reduction <add>, %25, %cst_10 [2] : vector<1x32x32xf32> to vector<1x32xf32>
    %27 = vector.shape_cast %26 : vector<1x32xf32> to vector<1x32x1xf32>
    %28 = tpu.reciprocal %27 {approx = true} : vector<1x32x1xf32> -> vector<1x32x1xf32>
    %29 = vector.broadcast %28 : vector<1x32x1xf32> to vector<1x32x32xf32>
    %30 = arith.mulf %25, %29 : vector<1x32x32xf32>
    %31 = arith.truncf %14 : vector<1x8x32xf32> to vector<1x8x32xbf16>
    %32 = arith.truncf %30 : vector<1x32x32xf32> to vector<1x32x32xbf16>
    %cst_11 = arith.constant dense<0.000000e+00> : vector<1x8x32xf32>
    %33 = tpu.matmul %31, %32, %cst_11 {dimension_numbers = #tpu.dot_dimension_numbers<[2], [2], [1], [1], [0, 0, 0, 1, 1, 1], [0], [0]>} : vector<1x8x32xbf16>, vector<1x32x32xbf16>, vector<1x8x32xf32> -> vector<1x8x32xf32>
    %34 = vector.shape_cast %33 : vector<1x8x32xf32> to vector<8x32xf32>
    %35 = arith.truncf %34 : vector<8x32xf32> to vector<8x32xbf16>
    %c0_12 = arith.constant 0 : index
    %c0_13 = arith.constant 0 : index
    %36 = vector.load %arg3[%c0_12, %c0_13] : memref<32x32xbf16, #tpu.memory_space<vmem>>, vector<32x32xbf16>
    %cst_14 = arith.constant dense<0.000000e+00> : vector<8x32xf32>
    %37 = tpu.matmul %35, %36, %cst_14 {dimension_numbers = #tpu.dot_dimension_numbers<[1], [0], [0], [1], [0, 0, 1, 1], [], []>} : vector<8x32xbf16>, vector<32x32xbf16>, vector<8x32xf32> -> vector<8x32xf32>
    %c0_15 = arith.constant 0 : index
    %c0_16 = arith.constant 0 : index
    %38 = vector.load %arg4[%c0_15, %c0_16] : memref<1x32xf32, #tpu.memory_space<vmem>>, vector<1x32xf32>
    %39 = vector.broadcast %38 : vector<1x32xf32> to vector<8x32xf32>
    %40 = arith.addf %37, %39 : vector<8x32xf32>
    %c0_17 = arith.constant 0 : index
    %c0_18 = arith.constant 0 : index
    %41 = vector.load %arg7[%c0_17, %c0_18] : memref<8x32xf32, #tpu.memory_space<vmem>>, vector<8x32xf32>
    tpu.vector_store %arg7[%c0_17, %c0_18], %40 {strides = array<i32>} : memref<8x32xf32, #tpu.memory_space<vmem>>, vector<8x32xf32>,
    return
  }
  func.func @transform_0(%arg0: i32) -> (i32, i32) {
    %c0_i32 = arith.constant 0 : i32
    %c0_i32_0 = arith.constant 0 : i32
    return %arg0, %c0_i32 : i32, i32
  }
  func.func @transform_1(%arg0: i32) -> (i32, i32) {
    %c0_i32 = arith.constant 0 : i32
    %c0_i32_0 = arith.constant 0 : i32
    %c0_i32_1 = arith.constant 0 : i32
    return %c0_i32, %c0_i32_0 : i32, i32
  }
  func.func @transform_2(%arg0: i32) -> (i32, i32) {
    %c0_i32 = arith.constant 0 : i32
    %c0_i32_0 = arith.constant 0 : i32
    %c0_i32_1 = arith.constant 0 : i32
    return %c0_i32, %c0_i32_0 : i32, i32
  }
  func.func @transform_3(%arg0: i32) -> (i32, i32) {
    %c0_i32 = arith.constant 0 : i32
    %c0_i32_0 = arith.constant 0 : i32
    %c0_i32_1 = arith.constant 0 : i32
    return %c0_i32, %c0_i32_0 : i32, i32
  }
  func.func @transform_4(%arg0: i32) -> (i32, i32) {
    %c0_i32 = arith.constant 0 : i32
    %c0_i32_0 = arith.constant 0 : i32
    %c0_i32_1 = arith.constant 0 : i32
    return %c0_i32, %c0_i32_0 : i32, i32
  }
  func.func @transform_5(%arg0: i32) -> (i32, i32) {
    %c0_i32 = arith.constant 0 : i32
    %c0_i32_0 = arith.constant 0 : i32
    %c0_i32_1 = arith.constant 0 : i32
    return %c0_i32, %c0_i32_0 : i32, i32
  }
  func.func @transform_6(%arg0: i32) -> (i32, i32) {
    %c0_i32 = arith.constant 0 : i32
    %c0_i32_0 = arith.constant 0 : i32
    return %arg0, %c0_i32 : i32, i32
  }
}

</mosaic_0001>

<bundles_post_ra>
// kernel: tpu_custom_call.1
= control target key start
LH: loop header
LB: loop body
LE: loop exit
PB: predicated region body
PF: predicated region fallthrough
CT: control target
= control target key end

     0   :  { %11 = vsyncpa [#allocation3], 0  ;;  %s1269_s0 = inlined_call_operand.vmem [shape: bf16[16,32], index: 0, kind: input, shape index: {}]   ;;  %s1270_s1 = inlined_call_operand.hbm [shape: bf16[32,96], index: 1, kind: input, shape index: {}]   ;;  %s1271_s2 = inlined_call_operand.hbm [shape: bf16[32,32], index: 2, kind: input, shape index: {}]   ;;  %s1272_s3 = inlined_call_operand.vmem [shape: f32[1,32], index: 3, kind: input, shape index: {}]   ;;  %s1273_s4 = inlined_call_operand.hbm [shape: f32[32,32], index: 4, kind: input, shape index: {}]   ;;  %s1274_s5 = inlined_call_operand.vmem [shape: f32[8,1], index: 5, kind: input, shape index: {}]   ;;  %s1275_s6 = inlined_call_operand.hbm [shape: f32[16,32], index: 6, kind: output, shape index: {}]  }
   0x1   :  { %12 = vsyncpa [#allocation6], 0 }
   0x2   :  { %13 = vsyncpa [#allocation4], 0 }
   0x3   :  { %15 = vsyncpa [#allocation4 + $0x1], 0  ;;  %s1083_s21 = smov 0   ;;  %s1085_s22 = smov 0  }
   0x4   :  { %s1087_s23 = smov 0   ;;  %s1089_s24 = smov 0  }
   0x5 LB: > { %s1104_s25 = sadd.s32 4294967295, %s1033_s24   ;;  %s717_s26 = sadd.s32 4294967294, %s1033_s24   ;;  %s1033_s24 = sphi %s1089_s24, %s1291_s24   ;;  %s1029_s23 = sphi %s1087_s23, %s1290_s23   ;;  %s1025_s22 = sphi %s1085_s22, %s1289_s22   ;;  %s1021_s21 = sphi %s1083_s21, %s1288_s21  }
   0x6   : > { %s1108_s27 = sadd.s32 1, %s1033_s24   ;;  %s159_s28 = sadd.s32 1, %s1029_s23 }
   0x7   : > { %s156_s29 = ssub.s32 %s1033_s24, %s1108_s27  ;;  %p169_p0 = scmp.ne.s32.totalorder %s1029_s23, %s1025_s22 }
   0x8   : > { %p157_p1 = scmp.eq.s32.totalorder %s156_s29, 0  ;;  %p170_p2 = scmp.eq.s32.totalorder %s1104_s25, 1 }
   0x9   : > { %p175_p3 = scmp.ne.s32.totalorder %s1025_s22, %s1021_s21  ;;  %p176_p4 = scmp.eq.s32.totalorder %s717_s26, 1 }
   0xa   : > { %s1119_s30 = scalar_select %p157_p1, %s1029_s23, %s159_s28  }
   0xb   : > { %p1121_p5 = por %p170_p2, %p169_p0  ;;  %p1125_p6 = por %p176_p4, %p175_p3 }
   0xc   : > { %p718_p7 = scmp.ge.s32.totalorder %s1033_s24, 1  ;;  %p183_p8 = scmp.lt.s32.totalorder %s1033_s24, 3 }
   0xd   : > { %s1278_s7 = scalar_select %p1121_p5, 1, 0 }
   0xe   : > { %s1279_s8 = scalar_select %p1125_p6, 1, 0 }
   0xf   : > { %p1276_p9 = scmp.eq.s32.totalorder %s1104_s25, 0  ;;  %p1132_p10 = pnand %p718_p7, %p183_p8 }
  0x10   : > { %s1035_s10 = smov [#allocation5]   ;;  %s1036_s13 = smov [#allocation2]  }
  0x11   : > { %p800_p11 = pneg %p1132_p10  ;;  %s208_s11 = sshll.u32 %s1035_s10, 4  ;;  %s209_s11 = int_to_ptr.vmem [resolvable:$true] %s208_s11 }
  0x12   : > { %s195_s14 = sshll.u32 %s1036_s13, 4  ;;  %s1037_s15 = smov [#allocation7]   ;;  %s196_s14 = int_to_ptr.vmem [resolvable:$true] %s195_s14 }
  0x13   : > { %p1140_p12 = pnand %p1276_p9, %p800_p11  ;;  %s224_s16 = sshll.u32 %s1037_s15, 4  ;;  %s225_s16 = int_to_ptr.vmem [resolvable:$true] %s224_s16 }
  0x14   : > { %s898_s17 = scalar_lea.vmem %s209_s11, 256  ;;  %p906_p3 = scmp.lt.s32.totalorder %s209_s11, %s209_s11 }
  0x15   : > { %p889_p13 = pneg %p1140_p12  ;;  %p899_p0 = scmp.ne.s32.totalorder %s209_s11, %s898_s17 }
  0x16   : > { %p907_p4 = scmp.lt.s32.totalorder %s898_s17, %s898_s17 }
  0x17   : > { %p901_p1 = pnand %p899_p0, %p889_p13 }
  0x18   : > { %p908_p7 = por %p907_p4, %p906_p3 }
  0x19   : > { %p902_p2 = pneg %p901_p1 }
  0x1b   : > { %p909_p8 = pnand %p908_p7, %p902_p2 }
  0x1d   : > { %912 = shalt.err (!%p909_p8)
}
  0x1e   : > { %s1038_s18 = smov 64   ;;  %s1039_s19 = smov 4  }
  0x1f   : > { %806 = dma.hbm_to_vmem [thread:$0]  (!%p1140_p12), %s1271_s2, 256, %s209_s11, [#allocation6], %s1038_s18, %s1038_s18, %s1039_s19  }
  0x20   : > { %s924_s28 = scalar_lea.vmem %s196_s14, 256  ;;  %p932_p9 = scmp.lt.s32.totalorder %s196_s14, %s196_s14 }
  0x21   : > { %p925_p11 = scmp.ne.s32.totalorder %s196_s14, %s924_s28  ;;  %p933_p6 = scmp.lt.s32.totalorder %s924_s28, %s924_s28 }
  0x23   : > { %p927_p0 = pnand %p925_p11, %p889_p13  ;;  %p934_p3 = por %p933_p6, %p932_p9 }
  0x25   : > { %p928_p1 = pneg %p927_p0 }
  0x27   : > { %p935_p2 = pnand %p934_p3, %p928_p1 }
  0x29   : > { %938 = shalt.err (!%p935_p2)
}
  0x2a   : > { %803 = dma.hbm_to_vmem [thread:$0]  (!%p1140_p12), %s1270_s1, 256, %s196_s14, [#allocation3], %s1038_s18, %s1038_s18, %s1039_s19  }
  0x2b   : > { %s950_s11 = scalar_lea.vmem %s225_s16, 512  ;;  %p958_p11 = scmp.lt.s32.totalorder %s225_s16, %s225_s16 }
  0x2c   : > { %p951_p4 = scmp.ne.s32.totalorder %s225_s16, %s950_s11  ;;  %p959_p0 = scmp.lt.s32.totalorder %s950_s11, %s950_s11 }
  0x2e   : > { %p953_p7 = pnand %p951_p4, %p889_p13  ;;  %p960_p5 = por %p959_p0, %p958_p11 }
  0x30   : > { %p954_p8 = pneg %p953_p7 }
  0x32   : > { %p961_p6 = pnand %p960_p5, %p954_p8 }
  0x34   : > { %964 = shalt.err (!%p961_p6)
}
  0x35   : > { %s1040_s13 = smov 128   ;;  %s1041_s15 = smov 8  }
  0x36   : > { %809 = dma.hbm_to_vmem [thread:$0]  (!%p1140_p12), %s1273_s4, 512, %s225_s16, [#allocation6], %s1040_s13, %s1040_s13, %s1041_s15  }
  0x37   : > { %250 = sbr.rel (%p1132_p10) target bundleno = 1334 (0x536), region = 44  ;;  %p1282_p9 = scmp.eq.s32.totalorder (!%p1132_p10), %s1104_s25, 0 }
  0x3c   : > { %1008 = dma.done.wait (%p1282_p9), [#allocation3], 256   ;;  %p1283_p13 = pmov %p1282_p9 }
  0x3d   : > { %p1284_p5 = pmov %p1282_p9 }
  0x3e   : > { %1010 = vsyncadd (%p1283_p13), [#allocation3], 4294967040 }
  0x3f   : > { %1012 = dma.done.wait (%p1284_p5), [#allocation6], 768   ;;  %p1285_p1 = pmov %p1284_p5 }
  0x40   : > { %p287_p3 = scmp.lt.s32.totalorder %s1104_s25, 1  ;;  %v1042_v0 = vmov 0.0   ;;  %vm1043_vm0 = vmmov 0   ;;  %v867_v1 = vld [vmem:[#allocation2 + $0x8] sm:$0xff]   ;;  %v868_v2 = vld [vmem:[#allocation2] sm:$0xff]   ;;  %vm309_vm1 = vcmask 261120  }
  0x41   : > { %1014 = vsyncadd (%p1285_p1), [#allocation6], 4294966528  ;;  %755 = vmatprep.subr.bf16.mxu0 %v1042_v0  ;;  %759 = vmatprep.mubr.msk.bf16.mxu0 %vm1043_vm0, %v1042_v0  ;;  %s1044_s19 = smov 96   ;;  %vm393_vm2 = vcmask 1043456   ;;  %vm386_vm3 = vcmask 64512   ;;  %v1045_v15 = vmov 0  }
  0x42   : > { %s288_s9 = scalar_select %p287_p3, %s1104_s25, 1  ;;  %756 = vmatpush3.bf16.msra.mxu0 %v867_v1  ;;  %865 = vset.pattern.permute.xlu1 %v1045_v15  ;;  %v365_v16 = vld [vmem:[#allocation7 + $0x10] sm:$0xff]  ;;  %v366_v20 = vld [vmem:[#allocation7 + $0x18] sm:$0xff]  ;;  %v363_v22 = vld [vmem:[#allocation7] sm:$0xff] }
  0x43   : > { %757 = vmatprep.subr.bf16.mxu0 %v1042_v0  ;;  %v364_v28 = vld [vmem:[#allocation7 + $0x8] sm:$0xff]  ;;  %v354_v32 = vld [vmem:[%s1274_s5] sm:$0xff]  ;;  %s1046_s29 = smov 64   ;;  %v869_v56 = vld [vmem:[#allocation5 + $0x8] sm:$0xff]   ;;  %s284_s10 = sand.u32 1, %s1025_s22  }
  0x44   : > { %s728_s12 = sshll.u32 %s288_s9, 2  ;;  %v870_v57 = vld [vmem:[#allocation5] sm:$0xff]   ;;  %s727_s11 = sshll.u32 %s284_s10, 3 }
  0x45   : > { %s290_s18 = scalar_lea.vmem %s1269_s0, %s728_s12  ;;  %s740_s17 = sshll.u32 %s1104_s25, 7 }
  0x46   : > { %758 = vmatpush3.bf16.msra.mxu0 %v868_v2  ;;  %v292_v3 = vld [vmem:[%s290_s18] sm:$0xf]  ;;  %s286_s20 = scalar_lea.vmem [#allocation8], %s727_s11  ;;  %s1227_s16 = scalar_lea.hbm %s1275_s6, %s740_s17 }
  0x47   : > { %777 = vmatprep.subr.bf16.mxu0 %v1042_v0  ;;  %s627_s9 = sshll.u32 %s286_s20, 4  ;;  %s614_s18 = scalar_lea.sflag [#allocation4], %s284_s10  ;;  %s1229_s9 = int_to_ptr.vmem [resolvable:$true] %s627_s9 }
  0x48   : > { %s965_s25 = scalar_lea.vmem %s1229_s9, 128  ;;  %p1286_p12 = scmp.ne.s32.totalorder %s1278_s7, 0 }
  0x49   : > { %760 = vmatmul.mubr.msk.bf16.vlgmr.msra.gmra.mxu0 %vm309_vm1, %v292_v3  ;;  %p966_p10 = scmp.ne.s32.totalorder %s1229_s9, %s965_s25 }
  0x4a   : > { %781 = vmatprep.mubr.msk.bf16.mxu0 %vm1043_vm0, %v1042_v0  ;;  %778 = vmatpush3.bf16.msra.mxu0 %v869_v56 }
  0x4b   : > { %779 = vmatprep.subr.bf16.mxu0 %v1042_v0  ;;  %p967_p2 = pnand %p966_p10, %p1286_p12 }
  0x4d   : > { %p968_p4 = pneg %p967_p2 }
  0x4e   : > { %780 = vmatpush3.bf16.msra.mxu0 %v870_v57 }
 0x109   : > { %v1193_v4 = vpop.f32.mrf.mxu0 }
 0x10a   : > { %v362_v5 = vpack.c.bf16 %v1193_v4, %v1193_v4  ;;  %v353_v9 = vmul.f32 0.35355338, %v1193_v4 }
 0x10b   : > { %v761_v6 = vpop.f32.mrf.mxu0 }
 0x10c   : > { %384 = vrot.lane.b32.xlu0 %v362_v5, %s1044_s19  ;;  %v361_v10 = vpack.c.bf16 %v353_v9, %v353_v9  ;;  %s1047_s19 = smov [#allocation8]  }
 0x10d   : > { %v350_v7 = vpop.f32.mrf.mxu0  ;;  %s969_s26 = sshll.u32 %s1047_s19, 4  ;;  %s970_s26 = int_to_ptr.vmem [resolvable:$false] %s969_s26 }
 0x10e   : > { %s971_s28 = scalar_lea.vmem %s970_s26, 256  ;;  %p972_p7 = scmp.lt.s32.totalorder %s1229_s9, %s970_s26 }
 0x10f   : > { %v762_v8 = vpop.f32.mrf.mxu0  ;;  %p973_p8 = scmp.lt.s32.totalorder %s971_s28, %s965_s25 }
 0x111   : > { %p974_p11 = por %p973_p8, %p972_p7 }
 0x113   : > { %p975_p0 = pnand %p974_p11, %p968_p4 }
 0x12a   : > { %367 = vxpose.xlu0.c.b16.start.end [1/1] (short) (narrow) %v361_v10, 32 }
 0x133   : > { %866 = vset.pattern.permute.xlu0 %v1045_v15 }
 0x17e   : > { %v385_v11 = vpop.permute.xlu0 %384 }
 0x17f   : > { %785 = vmatprep.subr.msk.bf16.mxu1 %vm393_vm2, %v385_v11  ;;  %v395_v12 = vsel %vm393_vm2, %v385_v11, 0 }
 0x180   : > { %764 = vmatpush3.bf16.msra.mxu1 %v395_v12 }
 0x181   : > { %769 = vmatprep.subr.bf16.mxu1 %v1042_v0 }
 0x18c   : > { %v375_v13 = vpop.trf.xlu0 }
 0x18d   : > { %765 = vmatprep.mubr.msk.bf16.mxu1 %vm386_vm3, %v375_v13 }
 0x190   : > { %v376_v14 = vpop.trf.xlu0 }
 0x191   : > { %766 = vmatmul.mubr.msk.bf16.vlgmr.msra.gmra.mxu1 %vm386_vm3, %v376_v14 }
 0x192   : > { %773 = vmatprep.mubr.msk.bf16.mxu1 %vm1043_vm0, %v1042_v0 }
 0x251   : > { %v767_v17 = vpop.f32.mrf.mxu1 }
 0x252   : > { %v440_v18 = vadd.f32 %v767_v17, %v365_v16 }
 0x253   : > { %v431_v19 = vpop.f32.mrf.mxu1 }
 0x254   : > { %v452_v21 = vsel %vm309_vm1, %v440_v18, -inf  ;;  %v432_v25 = vadd.f32 %v431_v19, %v363_v22 }
 0x255   : > { %453 = vmax.xlane.f32.xlu1 %v452_v21  ;;  %v768_v23 = vpop.f32.mrf.mxu1 }
 0x256   : > { %v443_v24 = vadd.f32 %v768_v23, %v366_v20  ;;  %v446_v30 = vsel %vm309_vm1, %v432_v25, -inf }
 0x257   : > { %v434_v27 = vpop.f32.mrf.mxu1 }
 0x258   : > { %v455_v26 = vsel %vm309_vm1, %v443_v24, -inf  ;;  %v435_v29 = vadd.f32 %v434_v27, %v364_v28 }
 0x259   : > { %456 = vmax.xlane.f32.xlu1 %v455_v26 }
 0x25a   : > { %v449_v31 = vsel %vm309_vm1, %v435_v29, -inf }
 0x25d   : > { %447 = vmax.xlane.f32.xlu1 %v446_v30 }
 0x261   : > { %450 = vmax.xlane.f32.xlu1 %v449_v31 }
 0x272   : > { %357 = vperm.xlu1 %865, %v354_v32  }
 0x2de   : > { %v454_v33 = vpop.xlane.xlu1 %453 }
 0x2df   : > { %v460_v34 = vsub.f32 %v440_v18, %v454_v33 }
 0x2e1   : > { %v466_v35 = vmul.f32 1.442695, %v460_v34 }
 0x2e2   : > { %v457_v36 = vpop.xlane.xlu1 %456 }
 0x2e3   : > { %871 = vpow2.f32 %v466_v35  ;;  %v461_v37 = vsub.f32 %v443_v24, %v457_v36 }
 0x2e5   : > { %v468_v38 = vmul.f32 1.442695, %v461_v37 }
 0x2e6   : > { %v448_v39 = vpop.xlane.xlu1 %447 }
 0x2e7   : > { %873 = vpow2.f32 %v468_v38  ;;  %v458_v40 = vsub.f32 %v432_v25, %v448_v39 }
 0x2e9   : > { %v462_v41 = vmul.f32 1.442695, %v458_v40 }
 0x2ea   : > { %v451_v42 = vpop.xlane.xlu1 %450 }
 0x2eb   : > { %875 = vpow2.f32 %v462_v41  ;;  %v459_v43 = vsub.f32 %v435_v29, %v451_v42 }
 0x2ed   : > { %v464_v44 = vmul.f32 1.442695, %v459_v43 }
 0x2ee   : > { %v358_v53 = vpop.permute.xlu1 %357 }
 0x2ef   : > { %877 = vpow2.f32 %v464_v44  ;;  %v360_v54 = vadd.f32 %v358_v53, %v1193_v4 }
 0x2f0   : > { %v872_v45 = vpop.eup %871 }
 0x2f1   : > { %v476_v46 = vsel %vm309_vm1, %v872_v45, 0.0  ;;  %v490_v55 = vpack.c.bf16 %v360_v54, %v360_v54 }
 0x2f2   : > { %477 = vadd.xlane.f32.xlu1 %v476_v46 }
 0x2f4   : > { %v874_v47 = vpop.eup %873 }
 0x2f5   : > { %v479_v48 = vsel %vm309_vm1, %v874_v47, 0.0 }
 0x2f6   : > { %480 = vadd.xlane.f32.xlu0 %v479_v48 }
 0x2f8   : > { %v876_v49 = vpop.eup %875 }
 0x2f9   : > { %v470_v50 = vsel %vm309_vm1, %v876_v49, 0.0 }
 0x2fa   : > { %471 = vadd.xlane.f32.xlu0 %v470_v50 }
 0x2fc   : > { %v878_v51 = vpop.eup %877 }
 0x2fd   : > { %v473_v52 = vsel %vm309_vm1, %v878_v51, 0.0 }
 0x2fe   : > { %474 = vadd.xlane.f32.xlu0 %v473_v52 }
 0x314   : > { %494 = vrot.lane.b32.xlu0 %v490_v55, %s1046_s29 }
 0x37b   : > { %v478_v58 = vpop.xlane.xlu1 %477 }
 0x37c   : > { %879 = vrcp.f32 %v478_v58 }
 0x37f   : > { %v481_v59 = vpop.xlane.xlu0 %480 }
 0x380   : > { %881 = vrcp.f32 %v481_v59 }
 0x383   : > { %v472_v60 = vpop.xlane.xlu0 %471 }
 0x384   : > { %883 = vrcp.f32 %v472_v60 }
 0x387   : > { %v475_v61 = vpop.xlane.xlu0 %474 }
 0x388   : > { %885 = vrcp.f32 %v475_v61 }
 0x389   : > { %v880_v62 = vpop.eup %879 }
 0x38a   : > { %v488_v1 = vmul.f32 %v880_v62, %v872_v45 }
 0x38b   : > { %v495_v11 = vpop.permute.xlu0 %494 }
 0x38d   : > { %v882_v63 = vpop.eup %881 }
 0x38e   : > { %v489_v2 = vmul.f32 %v882_v63, %v874_v47 }
 0x390   : > { %v492_v3 = vpack.c.bf16 %v489_v2, %v488_v1 }
 0x391   : > { %v884_v5 = vpop.eup %883 }
 0x392   : > { %v503_v4 = vsel %vm309_vm1, %v492_v3, 0  ;;  %v486_v7 = vmul.f32 %v884_v5, %v876_v49 }
 0x393   : > { %770 = vmatpush3.bf16.xpose.msra.mxu1 %v503_v4 }
 0x394   : > { %771 = vmatprep.subr.bf16.mxu1 %v1042_v0  ;;  %v735_v0 = vld [vmem:[%s1272_s3] ss:$0 sm:$0xff] }
 0x395   : > { %v886_v6 = vpop.eup %885 }
 0x396   : > { %v487_v8 = vmul.f32 %v886_v6, %v878_v51 }
 0x398   : > { %v491_v9 = vpack.c.bf16 %v487_v8, %v486_v7 }
 0x39a   : > { %v500_v10 = vsel %vm309_vm1, %v491_v9, 0 }
 0x39b   : > { %772 = vmatpush3.bf16.xpose.msra.mxu1 %v500_v10 }
 0x3a2   : > { %774 = vmatmul.mubr.msk.bf16.vlgmr.msra.gmra.mxu1 %vm309_vm1, %v495_v11 }
 0x462   : > { %v539_v12 = vpop.f32.mrf.mxu1 }
 0x463   : > { %v545_v13 = vpack.c.bf16 %v539_v12, %v539_v12 }
 0x464   : > { %v775_v14 = vpop.f32.mrf.mxu1 }
 0x465   : > { %782 = vmatmul.mubr.msk.bf16.vlgmr.msra.gmra.mxu0 %vm309_vm1, %v545_v13 }
 0x466   : > { %v542_v15 = vpop.f32.mrf.mxu1 }
 0x468   : > { %v776_v16 = vpop.f32.mrf.mxu1 }
 0x525   : > { %v606_v17 = vpop.f32.mrf.mxu0 }
 0x526   : > { %v607_v18 = vadd.f32 %v735_v0, %v606_v17 }
 0x527   : > { %v783_v19 = vpop.f32.mrf.mxu0 }
 0x528   : > { %612 = vst.msk [vmem:[%s286_s20] sm:$0xff] %vm309_vm1, %v607_v18 }
 0x529   : > { %v609_v20 = vpop.f32.mrf.mxu0 }
 0x52a   : > { %978 = shalt.err (!%p975_p0)
}
 0x52b   : > { %s979_s29 = scalar_lea.hbm %s1227_s16, 128  ;;  %s983_s13 = scalar_lea.hbm %s1275_s6, 256 }
 0x52c   : > { %p980_p6 = scmp.ne.s32.totalorder %s1227_s16, %s979_s29  ;;  %p984_p5 = scmp.lt.s32.totalorder %s1227_s16, %s1275_s6 }
 0x52d   : > { %p985_p1 = scmp.lt.s32.totalorder %s983_s13, %s979_s29 }
 0x52e   : > { %p981_p9 = pnand %p980_p6, %p1286_p12 }
 0x52f   : > { %p986_p3 = por %p985_p1, %p984_p5 }
 0x530   : > { %p982_p13 = pneg %p981_p9 }
 0x532   : > { %p987_p10 = pnand %p986_p3, %p982_p13 }
 0x534   : > { %990 = shalt.err (!%p987_p10)
}
 0x535   : > { %798 = dma.vmem_to_hbm [thread:$0]  (%p1286_p12), %s1229_s9, 128, %s1227_s16, %s614_s18   ;;  %v784_v21 = vpop.f32.mrf.mxu0 }
 0x536 PF: > { %p820_p2 = scmp.ge.s32.totalorder %s1033_s24, 2  ;;  %s639_s20 = sand.u32 1, %s1021_s21  }
 0x537   : > { %p1287_p4 = scmp.ne.s32.totalorder %s1279_s8, 0  ;;  %s640_s12 = scalar_lea.sflag [#allocation4], %s639_s20 }
 0x539   : > { %p811_p7 = pnand %p820_p2, %p1287_p4 }
 0x53b   : > { %p812_p8 = pneg %p811_p7 }
 0x53d   : > { %1016 = dma.done.wait (%p812_p8), %s640_s12, 128  }
 0x53e   : > { %1018 = vsyncadd (%p812_p8), %s640_s12, 4294967168  ;;  %p18_p11 = scmp.ge.s32.totalorder %s1108_s27, 4   ;;  %s1288_s21 = smov %s1025_s22 }
 0x53f   : > { %s1289_s22 = smov %s1029_s23  ;;  %s1290_s23 = smov %s1119_s30 }
 0x540   : > { %s1291_s24 = smov %s1108_s27  ;;  %20 = sbr.rel (!%p18_p11) target bundleno = 5 (0x5), region = 92 }
 0x545   :  { %645 = vsyncpa [#allocation3], 1 }
 0x546   :  { %647 = vsyncpa [#allocation3 + $0x1], 1 }
 0x547   :  { %648 = vsyncpa [#allocation6], 1 }
 0x548   :  { %649 = vsyncpa [#allocation4], 1 }
 0x549   :  { %651 = vsyncpa [#allocation4 + $0x1], 1 }

</bundles_post_ra>
